<compile_context>
chip_gen: v5e
topology: v5e:2x2
jax: 0.10.0
libtpu: 0.0.40
codegen_flags: <defaults>
</compile_context>

<pallas_src>
import functools

import jax
import jax.numpy as jnp
import numpy as np
from jax.experimental import pallas as pl
from jax.experimental.pallas import tpu as pltpu


def _convt_tanh_kernel(x_ref, w_ref, m_ref, o_ref, *, H, W, K, pad_eq):
    """One image: fused (transposed-conv-as-conv) + bias + tanh.

    x_ref : (1, cin_pad, H*W)       padded input; channel `Cin` is the all-ones
                                    bias row, remaining pad channels are zero.
    w_ref : (K*K, cout_pad, cin_pad) per-tap flipped-conv weights; bias folded
                                    into the center tap's ones-channel column.
    m_ref : (K*K, H*W)              per-tap 0/1 border masks (f32) == padding.
    o_ref : (1, cout_pad, H*W)      output, flattened NCHW (pad rows are zero).
    """
    HW = H * W
    xv = x_ref[0]                                     # (cin_pad, HW) f32
    cout_pad = o_ref.shape[1]

    acc = jnp.zeros((cout_pad, HW), jnp.float32)
    t = 0
    for ky in range(K):
        dy = ky - pad_eq
        for kx in range(K):
            dx = kx - pad_eq
            s = dy * W + dx                           # flat pixel shift
            if s == 0:
                # Center tap: mask is all-ones -> keep the bias row intact.
                col = xv
            else:
                shifted = pltpu.roll(xv, (-s) % HW, axis=1)    # XLU lane rotate
                col = shifted * m_ref[pl.ds(t, 1), :]          # border mask == pad
            acc = acc + jnp.dot(w_ref[t], col,
                                preferred_element_type=jnp.float32)
            t += 1

    o_ref[0] = jnp.tanh(acc)                          # full (8, HW) unmasked store


def conv_transpose_tanh(x_nchw, w_taps, masks, *, K, pad_eq, cin_pad, cout):
    """x_nchw: (N, Cin, H, W) f32; w_taps: (K*K, cout_pad, cin_pad); masks: (K*K, H*W)."""
    N, Cin, H, W = x_nchw.shape
    HW = H * W
    kk, cout_pad, cin_pad_w = w_taps.shape
    assert kk == K * K and cin_pad_w == cin_pad

    # Pad channels to a sublane multiple and append the all-ones bias row
    # (folds the bias into the matmul); contiguous reshape is free.
    x_flat = x_nchw.reshape(N, Cin, HW)
    ones_row = jnp.ones((N, 1, HW), jnp.float32)
    zero_rows = jnp.zeros((N, cin_pad - Cin - 1, HW), jnp.float32)
    x_pad = jnp.concatenate([x_flat, ones_row, zero_rows], axis=1)

    kernel = functools.partial(_convt_tanh_kernel, H=H, W=W, K=K, pad_eq=pad_eq)

    out_flat = pl.pallas_call(
        kernel,
        out_shape=jax.ShapeDtypeStruct((N, cout_pad, HW), jnp.float32),
        grid=(N,),
        in_specs=[
            pl.BlockSpec((1, cin_pad, HW), lambda n: (n, 0, 0)),
            pl.BlockSpec((K * K, cout_pad, cin_pad), lambda n: (0, 0, 0)),
            pl.BlockSpec((K * K, HW), lambda n: (0, 0)),
        ],
        out_specs=pl.BlockSpec((1, cout_pad, HW), lambda n: (n, 0, 0)),
        compiler_params=pltpu.CompilerParams(
            dimension_semantics=("parallel",)),
    )(x_pad, w_taps, masks)

    # Slice off the padded output rows and reshape back to NCHW (both free).
    return out_flat[:, :cout, :].reshape(N, cout, H, W)


def make_weight_taps(w_pt, bias, groups, *, K, pad_eq, cin_pad, cout_pad):
    """PyTorch ConvTranspose2d weight (Cin, Cout//g, K, K) -> per-tap dense,
    spatially flipped regular-conv weights (K*K, cout_pad, cin_pad) with the
    group block-structure materialized as zeros and the bias folded into the
    center tap's ones-channel column (column index == Cin)."""
    w_np = np.asarray(w_pt, np.float32)
    b_np = np.asarray(bias, np.float32)
    Cin, opg, K_, _ = w_np.shape
    assert K_ == K
    ipg = Cin // groups
    cout = opg * groups
    taps = np.zeros((K * K, cout_pad, cin_pad), np.float32)
    for g in range(groups):
        for ol in range(opg):
            co = g * opg + ol
            blk = w_np[g * ipg:(g + 1) * ipg, ol][:, ::-1, ::-1]   # flip kH,kW
            for ky in range(K):
                for kx in range(K):
                    taps[ky * K + kx, co, g * ipg:(g + 1) * ipg] = blk[:, ky, kx]
    center = pad_eq * K + pad_eq          # tap with dy = dx = 0 (mask all-ones)
    taps[center, :cout, Cin] = b_np       # bias via the all-ones input channel
    return jnp.asarray(taps)


def make_masks(H, W, K, pad_eq):
    """(K*K, H*W) f32 0/1 border masks: mask[t, p]=1 iff tap t reads a pixel
    inside the image for output pixel p (this realizes the conv zero padding
    and also kills the circular wrap from the lane roll)."""
    HW = H * W
    yy, xx = np.divmod(np.arange(HW), W)
    masks = np.zeros((K * K, HW), np.float32)
    for ky in range(K):
        dy = ky - pad_eq
        for kx in range(K):
            dx = kx - pad_eq
            ok = (yy >= -dy) & (yy < H - dy) & (xx >= -dx) & (xx < W - dx)
            masks[ky * K + kx] = ok.astype(np.float32)
    return jnp.asarray(masks)


def reference_nchw(x_nchw, w_pt, bias, groups, pad_eq):
    """Pure-JAX grouped-conv reference of the same transposed-conv + tanh."""
    Cin, opg, K, _ = w_pt.shape
    Cout = opg * groups
    ipg = Cin // groups
    w_f = jnp.flip(w_pt, axis=(2, 3)).reshape(groups, ipg, opg, K, K)
    w_oihw = jnp.transpose(w_f, (0, 2, 1, 3, 4)).reshape(Cout, ipg, K, K)
    out = jax.lax.conv_general_dilated(
        x_nchw, w_oihw, window_strides=(1, 1),
        padding=((pad_eq, pad_eq), (pad_eq, pad_eq)),
        dimension_numbers=("NCHW", "OIHW", "NCHW"),
        feature_group_count=groups)
    return jnp.tanh(out + bias[None, :, None, None])


if __name__ == "__main__":
    # Shapes implied by the PyTorch spec: x1 = torch.randn(1, 28, 16, 16).
    N, Cin, H, W = 1, 28, 16, 16
    K, groups, Cout = 3, 4, 4          # valid reinterpretation (see TODO above)
    PAD_T = 1                          # ConvTranspose2d padding
    PAD_EQ = K - 1 - PAD_T             # equivalent regular-conv padding = 1
    CIN_PAD = 32                       # channels (+1 bias row) padded to 32 sublanes
    COUT_PAD = 8                       # output padded to one full sublane tile

    key = jax.random.PRNGKey(0)
    k_x, k_w, k_b = jax.random.split(key, 3)
    x_nchw = jax.random.normal(k_x, (N, Cin, H, W), jnp.float32)
    w_pt = jax.random.normal(k_w, (Cin, Cout // groups, K, K), jnp.float32) * 0.1
    bias = jax.random.normal(k_b, (Cout,), jnp.float32) * 0.1

    w_taps = make_weight_taps(w_pt, bias, groups, K=K, pad_eq=PAD_EQ,
                              cin_pad=CIN_PAD, cout_pad=COUT_PAD)
    masks = make_masks(H, W, K, PAD_EQ)

    out = conv_transpose_tanh(x_nchw, w_taps, masks, K=K, pad_eq=PAD_EQ,
                              cin_pad=CIN_PAD, cout=Cout)
    out = jax.block_until_ready(out)
    assert out.shape == (N, Cout, H, W)

    ref = reference_nchw(x_nchw, w_pt, bias, groups, PAD_EQ)
    np.testing.assert_allclose(np.asarray(out), np.asarray(ref),
                               rtol=1e-5, atol=1e-5)

    print("KERNEL_OK")
</pallas_src>

<mosaic_0001>
module attributes {stable_mosaic.version = 11 : i64} {
  func.func @_convt_tanh_kernel(%arg0: i32, %arg1: memref<1x32x256xf32, #tpu.memory_space<vmem>>, %arg2: memref<9x8x32xf32, #tpu.memory_space<vmem>>, %arg3: memref<9x256xf32, #tpu.memory_space<vmem>>, %arg4: memref<1x8x256xf32, #tpu.memory_space<vmem>>) attributes {dimension_semantics = [#tpu.dimension_semantics<parallel>], iteration_bounds = array<i64: 1>, scalar_prefetch = 0 : i64, scratch_operands = 0 : i64, tpu.core_type = #tpu.core_type<tc>, window_params = [{transform_indices = @transform_0, window_bounds = array<i64: 1, 32, 256>}, {pipeline_mode = #tpu.pipeline_mode<synchronous>, transform_indices = @transform_1, window_bounds = array<i64: 9, 8, 32>}, {pipeline_mode = #tpu.pipeline_mode<synchronous>, transform_indices = @transform_2, window_bounds = array<i64: 9, 256>}, {transform_indices = @transform_3, window_bounds = array<i64: 1, 8, 256>}]} {
    %c0 = arith.constant 0 : index
    %c0_0 = arith.constant 0 : index
    %c0_1 = arith.constant 0 : index
    %0 = vector.load %arg1[%c0, %c0_0, %c0_1] : memref<1x32x256xf32, #tpu.memory_space<vmem>>, vector<1x32x256xf32>
    %1 = vector.shape_cast %0 : vector<1x32x256xf32> to vector<32x256xf32>
    %cst = arith.constant 0.000000e+00 : f32
    %2 = vector.broadcast %cst : f32 to vector<8x256xf32>
    %c17_i32 = arith.constant 17 : i32
    %3 = tpu.dynamic_rotate %1 by %c17_i32 dim 1 : vector<32x256xf32>, i32 -> vector<32x256xf32>
    %c0_2 = arith.constant 0 : index
    %c0_3 = arith.constant 0 : index
    %4 = vector.load %arg3[%c0_2, %c0_3] : memref<9x256xf32, #tpu.memory_space<vmem>>, vector<1x256xf32>
    %5 = vector.broadcast %4 : vector<1x256xf32> to vector<32x256xf32>
    %6 = arith.mulf %3, %5 : vector<32x256xf32>
    %c0_4 = arith.constant 0 : index
    %c0_5 = arith.constant 0 : index
    %c0_6 = arith.constant 0 : index
    %7 = vector.load %arg2[%c0_4, %c0_5, %c0_6] : memref<9x8x32xf32, #tpu.memory_space<vmem>>, vector<1x8x32xf32>
    %8 = vector.shape_cast %7 : vector<1x8x32xf32> to vector<8x32xf32>
    %cst_7 = arith.constant dense<0.000000e+00> : vector<8x256xf32>
    %9 = tpu.matmul %8, %6, %cst_7 {dimension_numbers = #tpu.dot_dimension_numbers<[1], [0], [0], [1], [0, 0, 1, 1], [], []>} : vector<8x32xf32>, vector<32x256xf32>, vector<8x256xf32> -> vector<8x256xf32>
    %10 = arith.addf %2, %9 : vector<8x256xf32>
    %c16_i32 = arith.constant 16 : i32
    %11 = tpu.dynamic_rotate %1 by %c16_i32 dim 1 : vector<32x256xf32>, i32 -> vector<32x256xf32>
    %c1 = arith.constant 1 : index
    %c0_8 = arith.constant 0 : index
    %12 = vector.load %arg3[%c1, %c0_8] : memref<9x256xf32, #tpu.memory_space<vmem>>, vector<1x256xf32>
    %13 = vector.broadcast %12 : vector<1x256xf32> to vector<32x256xf32>
    %14 = arith.mulf %11, %13 : vector<32x256xf32>
    %c1_9 = arith.constant 1 : index
    %c0_10 = arith.constant 0 : index
    %c0_11 = arith.constant 0 : index
    %15 = vector.load %arg2[%c1_9, %c0_10, %c0_11] : memref<9x8x32xf32, #tpu.memory_space<vmem>>, vector<1x8x32xf32>
    %16 = vector.shape_cast %15 : vector<1x8x32xf32> to vector<8x32xf32>
    %cst_12 = arith.constant dense<0.000000e+00> : vector<8x256xf32>
    %17 = tpu.matmul %16, %14, %cst_12 {dimension_numbers = #tpu.dot_dimension_numbers<[1], [0], [0], [1], [0, 0, 1, 1], [], []>} : vector<8x32xf32>, vector<32x256xf32>, vector<8x256xf32> -> vector<8x256xf32>
    %18 = arith.addf %10, %17 : vector<8x256xf32>
    %c15_i32 = arith.constant 15 : i32
    %19 = tpu.dynamic_rotate %1 by %c15_i32 dim 1 : vector<32x256xf32>, i32 -> vector<32x256xf32>
    %c2 = arith.constant 2 : index
    %c0_13 = arith.constant 0 : index
    %20 = vector.load %arg3[%c2, %c0_13] : memref<9x256xf32, #tpu.memory_space<vmem>>, vector<1x256xf32>
    %21 = vector.broadcast %20 : vector<1x256xf32> to vector<32x256xf32>
    %22 = arith.mulf %19, %21 : vector<32x256xf32>
    %c2_14 = arith.constant 2 : index
    %c0_15 = arith.constant 0 : index
    %c0_16 = arith.constant 0 : index
    %23 = vector.load %arg2[%c2_14, %c0_15, %c0_16] : memref<9x8x32xf32, #tpu.memory_space<vmem>>, vector<1x8x32xf32>
    %24 = vector.shape_cast %23 : vector<1x8x32xf32> to vector<8x32xf32>
    %cst_17 = arith.constant dense<0.000000e+00> : vector<8x256xf32>
    %25 = tpu.matmul %24, %22, %cst_17 {dimension_numbers = #tpu.dot_dimension_numbers<[1], [0], [0], [1], [0, 0, 1, 1], [], []>} : vector<8x32xf32>, vector<32x256xf32>, vector<8x256xf32> -> vector<8x256xf32>
    %26 = arith.addf %18, %25 : vector<8x256xf32>
    %c1_i32 = arith.constant 1 : i32
    %27 = tpu.dynamic_rotate %1 by %c1_i32 dim 1 : vector<32x256xf32>, i32 -> vector<32x256xf32>
    %c3 = arith.constant 3 : index
    %c0_18 = arith.constant 0 : index
    %28 = vector.load %arg3[%c3, %c0_18] : memref<9x256xf32, #tpu.memory_space<vmem>>, vector<1x256xf32>
    %29 = vector.broadcast %28 : vector<1x256xf32> to vector<32x256xf32>
    %30 = arith.mulf %27, %29 : vector<32x256xf32>
    %c3_19 = arith.constant 3 : index
    %c0_20 = arith.constant 0 : index
    %c0_21 = arith.constant 0 : index
    %31 = vector.load %arg2[%c3_19, %c0_20, %c0_21] : memref<9x8x32xf32, #tpu.memory_space<vmem>>, vector<1x8x32xf32>
    %32 = vector.shape_cast %31 : vector<1x8x32xf32> to vector<8x32xf32>
    %cst_22 = arith.constant dense<0.000000e+00> : vector<8x256xf32>
    %33 = tpu.matmul %32, %30, %cst_22 {dimension_numbers = #tpu.dot_dimension_numbers<[1], [0], [0], [1], [0, 0, 1, 1], [], []>} : vector<8x32xf32>, vector<32x256xf32>, vector<8x256xf32> -> vector<8x256xf32>
    %34 = arith.addf %26, %33 : vector<8x256xf32>
    %c4 = arith.constant 4 : index
    %c0_23 = arith.constant 0 : index
    %c0_24 = arith.constant 0 : index
    %35 = vector.load %arg2[%c4, %c0_23, %c0_24] : memref<9x8x32xf32, #tpu.memory_space<vmem>>, vector<1x8x32xf32>
    %36 = vector.shape_cast %35 : vector<1x8x32xf32> to vector<8x32xf32>
    %cst_25 = arith.constant dense<0.000000e+00> : vector<8x256xf32>
    %37 = tpu.matmul %36, %1, %cst_25 {dimension_numbers = #tpu.dot_dimension_numbers<[1], [0], [0], [1], [0, 0, 1, 1], [], []>} : vector<8x32xf32>, vector<32x256xf32>, vector<8x256xf32> -> vector<8x256xf32>
    %38 = arith.addf %34, %37 : vector<8x256xf32>
    %c255_i32 = arith.constant 255 : i32
    %39 = tpu.dynamic_rotate %1 by %c255_i32 dim 1 : vector<32x256xf32>, i32 -> vector<32x256xf32>
    %c5 = arith.constant 5 : index
    %c0_26 = arith.constant 0 : index
    %40 = vector.load %arg3[%c5, %c0_26] : memref<9x256xf32, #tpu.memory_space<vmem>>, vector<1x256xf32>
    %41 = vector.broadcast %40 : vector<1x256xf32> to vector<32x256xf32>
    %42 = arith.mulf %39, %41 : vector<32x256xf32>
    %c5_27 = arith.constant 5 : index
    %c0_28 = arith.constant 0 : index
    %c0_29 = arith.constant 0 : index
    %43 = vector.load %arg2[%c5_27, %c0_28, %c0_29] : memref<9x8x32xf32, #tpu.memory_space<vmem>>, vector<1x8x32xf32>
    %44 = vector.shape_cast %43 : vector<1x8x32xf32> to vector<8x32xf32>
    %cst_30 = arith.constant dense<0.000000e+00> : vector<8x256xf32>
    %45 = tpu.matmul %44, %42, %cst_30 {dimension_numbers = #tpu.dot_dimension_numbers<[1], [0], [0], [1], [0, 0, 1, 1], [], []>} : vector<8x32xf32>, vector<32x256xf32>, vector<8x256xf32> -> vector<8x256xf32>
    %46 = arith.addf %38, %45 : vector<8x256xf32>
    %c241_i32 = arith.constant 241 : i32
    %47 = tpu.dynamic_rotate %1 by %c241_i32 dim 1 : vector<32x256xf32>, i32 -> vector<32x256xf32>
    %c6 = arith.constant 6 : index
    %c0_31 = arith.constant 0 : index
    %48 = vector.load %arg3[%c6, %c0_31] : memref<9x256xf32, #tpu.memory_space<vmem>>, vector<1x256xf32>
    %49 = vector.broadcast %48 : vector<1x256xf32> to vector<32x256xf32>
    %50 = arith.mulf %47, %49 : vector<32x256xf32>
    %c6_32 = arith.constant 6 : index
    %c0_33 = arith.constant 0 : index
    %c0_34 = arith.constant 0 : index
    %51 = vector.load %arg2[%c6_32, %c0_33, %c0_34] : memref<9x8x32xf32, #tpu.memory_space<vmem>>, vector<1x8x32xf32>
    %52 = vector.shape_cast %51 : vector<1x8x32xf32> to vector<8x32xf32>
    %cst_35 = arith.constant dense<0.000000e+00> : vector<8x256xf32>
    %53 = tpu.matmul %52, %50, %cst_35 {dimension_numbers = #tpu.dot_dimension_numbers<[1], [0], [0], [1], [0, 0, 1, 1], [], []>} : vector<8x32xf32>, vector<32x256xf32>, vector<8x256xf32> -> vector<8x256xf32>
    %54 = arith.addf %46, %53 : vector<8x256xf32>
    %c240_i32 = arith.constant 240 : i32
    %55 = tpu.dynamic_rotate %1 by %c240_i32 dim 1 : vector<32x256xf32>, i32 -> vector<32x256xf32>
    %c7 = arith.constant 7 : index
    %c0_36 = arith.constant 0 : index
    %56 = vector.load %arg3[%c7, %c0_36] : memref<9x256xf32, #tpu.memory_space<vmem>>, vector<1x256xf32>
    %57 = vector.broadcast %56 : vector<1x256xf32> to vector<32x256xf32>
    %58 = arith.mulf %55, %57 : vector<32x256xf32>
    %c7_37 = arith.constant 7 : index
    %c0_38 = arith.constant 0 : index
    %c0_39 = arith.constant 0 : index
    %59 = vector.load %arg2[%c7_37, %c0_38, %c0_39] : memref<9x8x32xf32, #tpu.memory_space<vmem>>, vector<1x8x32xf32>
    %60 = vector.shape_cast %59 : vector<1x8x32xf32> to vector<8x32xf32>
    %cst_40 = arith.constant dense<0.000000e+00> : vector<8x256xf32>
    %61 = tpu.matmul %60, %58, %cst_40 {dimension_numbers = #tpu.dot_dimension_numbers<[1], [0], [0], [1], [0, 0, 1, 1], [], []>} : vector<8x32xf32>, vector<32x256xf32>, vector<8x256xf32> -> vector<8x256xf32>
    %62 = arith.addf %54, %61 : vector<8x256xf32>
    %c239_i32 = arith.constant 239 : i32
    %63 = tpu.dynamic_rotate %1 by %c239_i32 dim 1 : vector<32x256xf32>, i32 -> vector<32x256xf32>
    %c8 = arith.constant 8 : index
    %c0_41 = arith.constant 0 : index
    %64 = vector.load %arg3[%c8, %c0_41] : memref<9x256xf32, #tpu.memory_space<vmem>>, vector<1x256xf32>
    %65 = vector.broadcast %64 : vector<1x256xf32> to vector<32x256xf32>
    %66 = arith.mulf %63, %65 : vector<32x256xf32>
    %c8_42 = arith.constant 8 : index
    %c0_43 = arith.constant 0 : index
    %c0_44 = arith.constant 0 : index
    %67 = vector.load %arg2[%c8_42, %c0_43, %c0_44] : memref<9x8x32xf32, #tpu.memory_space<vmem>>, vector<1x8x32xf32>
    %68 = vector.shape_cast %67 : vector<1x8x32xf32> to vector<8x32xf32>
    %cst_45 = arith.constant dense<0.000000e+00> : vector<8x256xf32>
    %69 = tpu.matmul %68, %66, %cst_45 {dimension_numbers = #tpu.dot_dimension_numbers<[1], [0], [0], [1], [0, 0, 1, 1], [], []>} : vector<8x32xf32>, vector<32x256xf32>, vector<8x256xf32> -> vector<8x256xf32>
    %70 = arith.addf %62, %69 : vector<8x256xf32>
    %71 = math.tanh %70 : vector<8x256xf32>
    %c0_46 = arith.constant 0 : index
    %c0_47 = arith.constant 0 : index
    %c0_48 = arith.constant 0 : index
    %72 = vector.load %arg4[%c0_46, %c0_47, %c0_48] : memref<1x8x256xf32, #tpu.memory_space<vmem>>, vector<1x8x256xf32>
    %73 = vector.shape_cast %72 : vector<1x8x256xf32> to vector<8x256xf32>
    %74 = vector.shape_cast %71 : vector<8x256xf32> to vector<1x8x256xf32>
    tpu.vector_store %arg4[%c0_46, %c0_47, %c0_48], %74 {strides = array<i32>} : memref<1x8x256xf32, #tpu.memory_space<vmem>>, vector<1x8x256xf32>,
    return
  }
  func.func @transform_0(%arg0: i32) -> (i32, i32, i32) {
    %c0_i32 = arith.constant 0 : i32
    %c0_i32_0 = arith.constant 0 : i32
    %c0_i32_1 = arith.constant 0 : i32
    return %arg0, %c0_i32, %c0_i32_0 : i32, i32, i32
  }
  func.func @transform_1(%arg0: i32) -> (i32, i32, i32) {
    %c0_i32 = arith.constant 0 : i32
    %c0_i32_0 = arith.constant 0 : i32
    %c0_i32_1 = arith.constant 0 : i32
    %c0_i32_2 = arith.constant 0 : i32
    return %c0_i32, %c0_i32_0, %c0_i32_1 : i32, i32, i32
  }
  func.func @transform_2(%arg0: i32) -> (i32, i32) {
    %c0_i32 = arith.constant 0 : i32
    %c0_i32_0 = arith.constant 0 : i32
    %c0_i32_1 = arith.constant 0 : i32
    return %c0_i32, %c0_i32_0 : i32, i32
  }
  func.func @transform_3(%arg0: i32) -> (i32, i32, i32) {
    %c0_i32 = arith.constant 0 : i32
    %c0_i32_0 = arith.constant 0 : i32
    %c0_i32_1 = arith.constant 0 : i32
    return %arg0, %c0_i32, %c0_i32_0 : i32, i32, i32
  }
}

</mosaic_0001>

<bundles_post_ra>
// kernel: tpu_custom_call.1
= control target key start
LH: loop header
LB: loop body
LE: loop exit
PB: predicated region body
PF: predicated region fallthrough
CT: control target
= control target key end

     0   :  { %8 = vsyncpa [#allocation3], 0  ;;  %s1368_s0 = inlined_call_operand.hbm [shape: f32[1,32,256], index: 0, kind: input, shape index: {}]   ;;  %s1369_s1 = inlined_call_operand.hbm [shape: f32[9,8,32], index: 1, kind: input, shape index: {}]   ;;  %s1370_s2 = inlined_call_operand.hbm [shape: f32[9,256], index: 2, kind: input, shape index: {}]   ;;  %s1371_s3 = inlined_call_operand.hbm [shape: f32[1,8,256], index: 3, kind: output, shape index: {}]  }
   0x1   :  { %9 = vsyncpa [#allocation6], 0  ;;  %s28_s14 = sshll.u32 %s1369_s1, 4  ;;  %s29_s14 = int_to_ptr.hbm [resolvable:$true] %s28_s14 }
   0x2   :  { %10 = vsyncpa [#allocation4], 0  ;;  %s971_s15 = smov [#allocation5]   ;;  %s15_s19 = sshll.u32 %s1368_s0, 4  ;;  %s16_s19 = int_to_ptr.hbm [resolvable:$true] %s15_s19 }
   0x3   :  { %s30_s16 = sshll.u32 %s971_s15, 4  ;;  %s972_s20 = smov 128   ;;  %s31_s16 = int_to_ptr.vmem [resolvable:$true] %s30_s16 }
   0x4   :  { %s973_s21 = smov 8   ;;  %s974_s22 = smov [#allocation2]  }
   0x5   :  { %36 = dma.hbm_to_vmem [thread:$0]  %s29_s14, 1152, %s31_s16, [#allocation6], %s972_s20, %s972_s20, %s973_s21  }
   0x6   :  { %s17_s23 = sshll.u32 %s974_s22, 4  ;;  %s975_s24 = smov 256   ;;  %s18_s23 = int_to_ptr.vmem [resolvable:$true] %s17_s23 }
   0x7   :  { %s976_s25 = smov 16   ;;  %s41_s27 = sshll.u32 %s1370_s2, 4  ;;  %s42_s27 = int_to_ptr.hbm [resolvable:$true] %s41_s27 }
   0x8   :  { %23 = dma.hbm_to_vmem [thread:$0]  %s16_s19, 1024, %s18_s23, [#allocation3], %s975_s24, %s975_s24, %s976_s25  }
   0x9   :  { %s977_s28 = smov [#allocation7]  }
   0xa   :  { %s43_s29 = sshll.u32 %s977_s28, 4  ;;  %s44_s29 = int_to_ptr.vmem [resolvable:$true] %s43_s29 }
   0xb   :  { %49 = dma.hbm_to_vmem [thread:$0]  %s42_s27, 512, %s44_s29, [#allocation6], %s975_s24, %s975_s24, %s976_s25  }
   0xc   :  { %965 = dma.done.wait [#allocation3], 1024  }
   0xd   :  { %966 = vsyncadd [#allocation3], 4294966272 }
   0xe   :  { %967 = dma.done.wait [#allocation6], 1664  }
   0xf   :  { %968 = vsyncadd [#allocation6], 4294965632  ;;  %v1017_v0 = vld [vmem:[#allocation2 + $0x30] sm:$0xff]  ;;  %s978_s0 = smov 17   ;;  %v1022_v1 = vld [vmem:[#allocation2 + $0x20] sm:$0xff]  ;;  %s979_s2 = smov 15   ;;  %v86_v11 = vlaneseq }
  0x10   :  { %118 = vrot.lane.b32.xlu1 %v1017_v0, %s976_s25  ;;  %76 = vrot.lane.b32.xlu0 %v1017_v0, %s978_s0  ;;  %v1025_v2 = vld [vmem:[#allocation2 + $0x38] sm:$0xff]  ;;  %v1030_v3 = vld [vmem:[#allocation2 + $0x28] sm:$0xff]  ;;  %v1037_v4 = vld [vmem:[#allocation2 + $0x10] sm:$0xff]  ;;  %s980_s30 = smov 1   ;;  %s981_s4 = smov 127   ;;  %vm154_vm4 = vcmask 261120  }
  0x11   :  { %74 = vrot.lane.b32.xlu2 %v1022_v1, %s978_s0  ;;  %v1040_v5 = vld [vmem:[#allocation2 + $0x18] sm:$0xff]  ;;  %v1047_v6 = vld [vmem:[#allocation2 + $0x8] sm:$0xff]  ;;  %v1049_v7 = vld [vmem:[#allocation2] sm:$0xff]  ;;  %s982_s5 = smov 113   ;;  %s983_s6 = smov 112   ;;  %v1091_v14 = vand.u32 127, %v86_v11 }
  0x12   :  { %v138_v16 = vld [vmem:[#allocation7 + $0x1] ss:$8 sm:$0x3]  ;;  %v97_v17 = vld [vmem:[#allocation7] ss:$8 sm:$0x3] }
  0x13   :  { %vm88_vm0 = vcmp.lt.s32.totalorder %v1091_v14, 17  ;;  %vm128_vm1 = vcmp.lt.s32.totalorder %v1091_v14, 16  ;;  %v1099_v18 = vperm.slane %v138_v16, 0  ;;  %v1101_v19 = vperm.slane %v138_v16, 1  ;;  %s984_s7 = smov 111   ;;  %s985_s8 = smov [#allocation8]  }
  0x14   :  { %v1103_v20 = vperm.slane %v97_v17, 0  ;;  %v1105_v21 = vperm.slane %v97_v17, 1  ;;  %v267_v62 = vld [vmem:[#allocation7 + $0x2] ss:$8 sm:$0x3]  ;;  %vm257_vm2 = vcmp.lt.s32.totalorder %v1091_v14, 15 }
  0x15   :  { %v1178_v63 = vperm.slane %v267_v62, 0  ;;  %vm344_vm3 = vcmp.lt.s32.totalorder %v1091_v14, 1  ;;  %vm478_vm5 = vcmp.lt.s32.totalorder %v1091_v14, 127  ;;  %vm565_vm6 = vcmp.lt.s32.totalorder %v1091_v14, 113  ;;  %s819_s9 = sshll.u32 %s985_s8, 4  ;;  %s821_s12 = sshll.u32 %s1371_s3, 4  ;;  %s820_s9 = int_to_ptr.vmem [resolvable:$true] %s819_s9  ;;  %s822_s12 = int_to_ptr.hbm [resolvable:$true] %s821_s12 }
  0x16   :  { %vm652_vm7 = vcmp.lt.s32.totalorder %v1091_v14, 112  ;;  %vm739_vm8 = vcmp.lt.s32.totalorder %v1091_v14, 111 }
  0x18   :  { %126 = vrot.lane.b32.xlu1 %v1025_v2, %s976_s25  ;;  %84 = vrot.lane.b32.xlu0 %v1025_v2, %s978_s0 }
  0x19   :  { %82 = vrot.lane.b32.xlu2 %v1030_v3, %s978_s0 }
  0x20   :  { %124 = vrot.lane.b32.xlu1 %v1030_v3, %s976_s25  ;;  %116 = vrot.lane.b32.xlu0 %v1022_v1, %s976_s25 }
  0x21   :  { %72 = vrot.lane.b32.xlu2 %v1037_v4, %s978_s0 }
  0x28   :  { %80 = vrot.lane.b32.xlu0 %v1040_v5, %s978_s0  ;;  %114 = vrot.lane.b32.xlu1 %v1037_v4, %s976_s25 }
  0x29   :  { %122 = vrot.lane.b32.xlu2 %v1040_v5, %s976_s25 }
  0x30   :  { %78 = vrot.lane.b32.xlu1 %v1047_v6, %s978_s0  ;;  %70 = vrot.lane.b32.xlu0 %v1049_v7, %s978_s0 }
  0x31   :  { %112 = vrot.lane.b32.xlu2 %v1049_v7, %s976_s25 }
  0x38   :  { %247 = vrot.lane.b32.xlu1 %v1017_v0, %s979_s2  ;;  %120 = vrot.lane.b32.xlu0 %v1047_v6, %s976_s25 }
  0x39   :  { %255 = vrot.lane.b32.xlu2 %v1025_v2, %s979_s2 }
  0x40   :  { %342 = vrot.lane.b32.xlu1 %v1025_v2, %s980_s30  ;;  %334 = vrot.lane.b32.xlu0 %v1017_v0, %s980_s30 }
  0x41   :  { %245 = vrot.lane.b32.xlu2 %v1022_v1, %s979_s2 }
  0x48   :  { %332 = vrot.lane.b32.xlu1 %v1022_v1, %s980_s30  ;;  %253 = vrot.lane.b32.xlu0 %v1030_v3, %s979_s2 }
  0x49   :  { %340 = vrot.lane.b32.xlu2 %v1030_v3, %s980_s30 }
  0x50   :  { %251 = vrot.lane.b32.xlu1 %v1040_v5, %s979_s2  ;;  %243 = vrot.lane.b32.xlu0 %v1037_v4, %s979_s2 }
  0x51   :  { %330 = vrot.lane.b32.xlu2 %v1037_v4, %s980_s30 }
  0x58   :  { %241 = vrot.lane.b32.xlu1 %v1049_v7, %s979_s2  ;;  %338 = vrot.lane.b32.xlu0 %v1040_v5, %s980_s30 }
  0x59   :  { %249 = vrot.lane.b32.xlu2 %v1047_v6, %s979_s2 }
  0x60   :  { %336 = vrot.lane.b32.xlu1 %v1047_v6, %s980_s30  ;;  %328 = vrot.lane.b32.xlu0 %v1049_v7, %s980_s30 }
  0x61   :  { %468 = vrot.lane.b32.xlu2 %v1017_v0, %s981_s4 }
  0x68   :  { %466 = vrot.lane.b32.xlu1 %v1022_v1, %s981_s4  ;;  %476 = vrot.lane.b32.xlu0 %v1025_v2, %s981_s4 }
  0x69   :  { %474 = vrot.lane.b32.xlu2 %v1030_v3, %s981_s4 }
  0x6b   :  { %v75_v8 = vpop.permute.xlu2 %74 }
  0x70   :  { %472 = vrot.lane.b32.xlu1 %v1040_v5, %s981_s4  ;;  %464 = vrot.lane.b32.xlu0 %v1037_v4, %s981_s4 }
  0x71   :  { %462 = vrot.lane.b32.xlu2 %v1049_v7, %s981_s4 }
  0x73   :  { %v83_v9 = vpop.permute.xlu2 %82 }
  0x74   :  { %v91_v24 = vsel %vm88_vm0, %v75_v8, %v83_v9  ;;  %v95_v25 = vsel %vm88_vm0, %v83_v9, %v75_v8  ;;  %v1180_v8 = vperm.slane %v267_v62, 1 }
  0x75   :  { %v107_v35 = vmul.f32 %v1103_v20, %v95_v25  ;;  %v108_v36 = vmul.f32 %v1105_v21, %v91_v24 }
  0x78   :  { %555 = vrot.lane.b32.xlu1 %v1017_v0, %s982_s5  ;;  %470 = vrot.lane.b32.xlu0 %v1047_v6, %s981_s4 }
  0x79   :  { %563 = vrot.lane.b32.xlu2 %v1025_v2, %s982_s5 }
  0x7b   :  { %v73_v10 = vpop.permute.xlu2 %72 }
  0x80   :  { %650 = vrot.lane.b32.xlu1 %v1025_v2, %s983_s6  ;;  %642 = vrot.lane.b32.xlu0 %v1017_v0, %s983_s6 }
  0x81   :  { %553 = vrot.lane.b32.xlu2 %v1022_v1, %s982_s5 }
  0x82   :  { %v119_v12 = vpop.permute.xlu1 %118  ;;  %v77_v13 = vpop.permute.xlu0 %76 }
  0x83   :  { %v123_v15 = vpop.permute.xlu2 %122 }
  0x88   :  { %640 = vrot.lane.b32.xlu1 %v1022_v1, %s983_s6  ;;  %561 = vrot.lane.b32.xlu0 %v1030_v3, %s982_s5 }
  0x89   :  { %648 = vrot.lane.b32.xlu2 %v1030_v3, %s983_s6 }
  0x8a   :  { %v127_v22 = vpop.permute.xlu1 %126  ;;  %v85_v23 = vpop.permute.xlu0 %84 }
  0x8b   :  { %v136_v26 = vsel %vm128_vm1, %v127_v22, %v119_v12  ;;  %v132_v27 = vsel %vm128_vm1, %v119_v12, %v127_v22  ;;  %v96_v28 = vsel %vm88_vm0, %v85_v23, %v77_v13  ;;  %v92_v29 = vsel %vm88_vm0, %v77_v13, %v85_v23  ;;  %v1121_v30 = vpop.permute.xlu2 %112  ;;  %v354_v23 = vld [vmem:[#allocation7 + $0x3] ss:$8 sm:$0x3] }
  0x8c   :  { %v150_v31 = vmul.f32 %v1099_v18, %v136_v26  ;;  %v151_v32 = vmul.f32 %v1101_v19, %v132_v27  ;;  %v109_v33 = vmul.f32 %v1103_v20, %v96_v28  ;;  %v110_v34 = vmul.f32 %v1105_v21, %v92_v29 }
  0x8e   :  { %170 = vmatpush.msra.mxu0 %v150_v31  ;;  %190 = vmatpush.msra.mxu1 %v151_v32 }
  0x8f   :  { %213 = vmatpush.msra.mxu2 %v109_v33  ;;  %233 = vmatpush.msra.mxu3 %v110_v34 }
  0x90   :  { %559 = vrot.lane.b32.xlu1 %v1040_v5, %s982_s5  ;;  %551 = vrot.lane.b32.xlu0 %v1037_v4, %s982_s5 }
  0x91   :  { %214 = vmatpush.msra.mxu2 %v107_v35  ;;  %234 = vmatpush.msra.mxu3 %v108_v36 }
  0x92   :  { %v125_v37 = vpop.permute.xlu1 %124  ;;  %v117_v38 = vpop.permute.xlu0 %116  ;;  %638 = vrot.lane.b32.xlu2 %v1037_v4, %s983_s6 }
  0x93   :  { %v131_v39 = vsel %vm128_vm1, %v117_v38, %v125_v37  ;;  %v135_v40 = vsel %vm128_vm1, %v125_v37, %v117_v38  ;;  %v256_v41 = vpop.permute.xlu2 %255 }
  0x94   :  { %v148_v42 = vmul.f32 %v1099_v18, %v135_v40  ;;  %v149_v43 = vmul.f32 %v1101_v19, %v131_v39 }
  0x96   :  { %171 = vmatpush.msra.mxu0 %v148_v42  ;;  %191 = vmatpush.msra.mxu1 %v149_v43  ;;  %v111_v42 = vld [vmem:[#allocation5] sm:$0xff] }
  0x98   :  { %549 = vrot.lane.b32.xlu1 %v1049_v7, %s982_s5  ;;  %646 = vrot.lane.b32.xlu0 %v1040_v5, %s983_s6 }
  0x9a   :  { %v81_v44 = vpop.permute.xlu0 %80  ;;  %v115_v45 = vpop.permute.xlu1 %114  ;;  %557 = vrot.lane.b32.xlu2 %v1047_v6, %s982_s5 }
  0x9b   :  { %v90_v46 = vsel %vm88_vm0, %v73_v10, %v81_v44  ;;  %v94_v47 = vsel %vm88_vm0, %v81_v44, %v73_v10  ;;  %v130_v48 = vsel %vm128_vm1, %v115_v45, %v123_v15  ;;  %v134_v49 = vsel %vm128_vm1, %v123_v15, %v115_v45  ;;  %v1155_v50 = vpop.permute.xlu2 %245 }
  0x9c   :  { %v105_v51 = vmul.f32 %v1103_v20, %v94_v47  ;;  %v106_v52 = vmul.f32 %v1105_v21, %v90_v46  ;;  %v146_v53 = vmul.f32 %v1099_v18, %v134_v49  ;;  %v147_v54 = vmul.f32 %v1101_v19, %v130_v48 }
  0x9e   :  { %215 = vmatpush.msra.mxu2 %v105_v51  ;;  %235 = vmatpush.msra.mxu3 %v106_v52 }
  0x9f   :  { %172 = vmatpush.msra.mxu0 %v146_v53  ;;  %192 = vmatpush.msra.mxu1 %v147_v54 }
  0xa0   :  { %644 = vrot.lane.b32.xlu1 %v1047_v6, %s983_s6  ;;  %636 = vrot.lane.b32.xlu0 %v1049_v7, %s983_s6 }
  0xa2   :  { %v79_v55 = vpop.permute.xlu1 %78  ;;  %v71_v56 = vpop.permute.xlu0 %70  ;;  %729 = vrot.lane.b32.xlu2 %v1017_v0, %s984_s7 }
  0xa3   :  { %v89_v57 = vsel %vm88_vm0, %v71_v56, %v79_v55  ;;  %v93_v58 = vsel %vm88_vm0, %v79_v55, %v71_v56  ;;  %v341_v59 = vpop.permute.xlu2 %340 }
  0xa4   :  { %v103_v60 = vmul.f32 %v1103_v20, %v93_v58  ;;  %v104_v61 = vmul.f32 %v1105_v21, %v89_v57 }
  0xa6   :  { %216 = vmatpush.msra.mxu2 %v103_v60  ;;  %236 = vmatpush.msra.mxu3 %v104_v61  ;;  %v153_v60 = vld [vmem:[#allocation5 + $0x8] sm:$0xff] }
  0xa7   :  { %834 = vmatmul.msk.f32.vlgmr.msra.gmra.mxu2 %vm154_vm4, %v111_v42  ;;  %835 = vmatmul.msk.f32.vlgmr.msra.gmra.mxu3 %vm154_vm4, %v111_v42  ;;  %v503_v42 = vld [vmem:[#allocation5 + $0x28] sm:$0xff] }
  0xa8   :  { %727 = vrot.lane.b32.xlu1 %v1022_v1, %s984_s7  ;;  %737 = vrot.lane.b32.xlu0 %v1025_v2, %s984_s7 }
  0xaa   :  { %v248_v9 = vpop.permute.xlu1 %247  ;;  %v121_v10 = vpop.permute.xlu0 %120  ;;  %735 = vrot.lane.b32.xlu2 %v1030_v3, %s984_s7 }
  0xab   :  { %v129_v11 = vsel %vm128_vm1, %v1121_v30, %v121_v10  ;;  %v133_v12 = vsel %vm128_vm1, %v121_v10, %v1121_v30  ;;  %v261_v13 = vsel %vm257_vm2, %v248_v9, %v256_v41  ;;  %v265_v15 = vsel %vm257_vm2, %v256_v41, %v248_v9  ;;  %v331_v16 = vpop.permute.xlu2 %330 }
  0xac   :  { %v144_v17 = vmul.f32 %v1099_v18, %v133_v12  ;;  %v145_v20 = vmul.f32 %v1101_v19, %v129_v11  ;;  %v279_v21 = vmul.f32 %v1178_v63, %v265_v15  ;;  %v280_v22 = vmul.f32 %v1180_v8, %v261_v13 }
  0xad   :  { %v1203_v18 = vperm.slane %v354_v23, 0  ;;  %v1205_v19 = vperm.slane %v354_v23, 1 }
  0xae   :  { %173 = vmatpush.msra.mxu0 %v144_v17  ;;  %193 = vmatpush.msra.mxu1 %v145_v20 }
  0xaf   :  { %832 = vmatmul.msk.f32.vlgmr.msra.gmra.mxu0 %vm154_vm4, %v153_v60  ;;  %833 = vmatmul.msk.f32.vlgmr.msra.gmra.mxu1 %vm154_vm4, %v153_v60 }
  0xb0   :  { %298 = vmatpush.msrb.mxu0 %v279_v21  ;;  %318 = vmatpush.msrb.mxu1 %v280_v22 }
  0xb1   :  { %733 = vrot.lane.b32.xlu1 %v1040_v5, %s984_s7  ;;  %725 = vrot.lane.b32.xlu0 %v1037_v4, %s984_s7 }
  0xb2   :  { %v343_v24 = vpop.permute.xlu1 %342  ;;  %v335_v25 = vpop.permute.xlu0 %334  ;;  %723 = vrot.lane.b32.xlu2 %v1049_v7, %s984_s7 }
  0xb3   :  { %v348_v26 = vsel %vm344_vm3, %v335_v25, %v343_v24  ;;  %v352_v27 = vsel %vm344_vm3, %v343_v24, %v335_v25  ;;  %v250_v28 = vpop.permute.xlu2 %249 }
  0xb4   :  { %v366_v29 = vmul.f32 %v1203_v18, %v352_v27  ;;  %v367_v30 = vmul.f32 %v1205_v19, %v348_v26  ;;  %v575_v27 = vld [vmem:[#allocation7 + $0x6] ss:$8 sm:$0x3] }
  0xb6   :  { %385 = vmatpush.msrb.mxu2 %v366_v29  ;;  %405 = vmatpush.msrb.mxu3 %v367_v30  ;;  %v1289_v29 = vperm.slane %v575_v27, 0  ;;  %v1291_v30 = vperm.slane %v575_v27, 1  ;;  %v749_v27 = vld [vmem:[#allocation7 + $0x10] ss:$8 sm:$0x3] }
  0xb9   :  { %731 = vrot.lane.b32.xlu0 %v1047_v6, %s984_s7 }
  0xba   :  { %v333_v31 = vpop.permute.xlu1 %332  ;;  %v254_v32 = vpop.permute.xlu0 %253 }
  0xbb   :  { %v260_v33 = vsel %vm257_vm2, %v1155_v50, %v254_v32  ;;  %v264_v34 = vsel %vm257_vm2, %v254_v32, %v1155_v50  ;;  %v347_v35 = vsel %vm344_vm3, %v333_v31, %v341_v59  ;;  %v351_v36 = vsel %vm344_vm3, %v341_v59, %v333_v31  ;;  %v1231_v41 = vpop.permute.xlu2 %468 }
  0xbc   :  { %v277_v37 = vmul.f32 %v1178_v63, %v264_v34  ;;  %v278_v38 = vmul.f32 %v1180_v8, %v260_v33  ;;  %v364_v39 = vmul.f32 %v1203_v18, %v351_v36  ;;  %v365_v40 = vmul.f32 %v1205_v19, %v347_v35 }
  0xbe   :  { %299 = vmatpush.msrb.mxu0 %v277_v37  ;;  %319 = vmatpush.msrb.mxu1 %v278_v38 }
  0xbf   :  { %386 = vmatpush.msrb.mxu2 %v364_v39  ;;  %406 = vmatpush.msrb.mxu3 %v365_v40 }
  0xc2   :  { %v252_v43 = vpop.permute.xlu1 %251  ;;  %v244_v44 = vpop.permute.xlu0 %243 }
  0xc3   :  { %v259_v45 = vsel %vm257_vm2, %v244_v44, %v252_v43  ;;  %v263_v46 = vsel %vm257_vm2, %v252_v43, %v244_v44  ;;  %v475_v49 = vpop.permute.xlu2 %474 }
  0xc4   :  { %v275_v47 = vmul.f32 %v1178_v63, %v263_v46  ;;  %v276_v48 = vmul.f32 %v1180_v8, %v259_v45  ;;  %v416_v46 = vld [vmem:[#allocation5 + $0x20] sm:$0xff] }
  0xc6   :  { %300 = vmatpush.msrb.mxu0 %v275_v47  ;;  %320 = vmatpush.msrb.mxu1 %v276_v48 }
  0xca   :  { %v242_v50 = vpop.permute.xlu1 %241  ;;  %v339_v51 = vpop.permute.xlu0 %338 }
  0xcb   :  { %v346_v52 = vsel %vm344_vm3, %v331_v16, %v339_v51  ;;  %v350_v53 = vsel %vm344_vm3, %v339_v51, %v331_v16  ;;  %v258_v54 = vsel %vm257_vm2, %v242_v50, %v250_v28  ;;  %v262_v55 = vsel %vm257_vm2, %v250_v28, %v242_v50  ;;  %v463_v61 = vpop.permute.xlu2 %462 }
  0xcc   :  { %v362_v56 = vmul.f32 %v1203_v18, %v350_v53  ;;  %v363_v57 = vmul.f32 %v1205_v19, %v346_v52  ;;  %v273_v58 = vmul.f32 %v1178_v63, %v262_v55  ;;  %v274_v59 = vmul.f32 %v1180_v8, %v258_v54 }
  0xce   :  { %387 = vmatpush.msrb.mxu2 %v362_v56  ;;  %407 = vmatpush.msrb.mxu3 %v363_v57 }
  0xcf   :  { %301 = vmatpush.msrb.mxu0 %v273_v58  ;;  %321 = vmatpush.msrb.mxu1 %v274_v59 }
  0xd1   :  { %432 = vmatpush.msra.mxu0 %v1017_v0  ;;  %452 = vmatpush.msra.mxu1 %v1025_v2  ;;  %v282_v0 = vld [vmem:[#allocation5 + $0x10] sm:$0xff] }
  0xd2   :  { %v337_v62 = vpop.permute.xlu1 %336  ;;  %v329_v9 = vpop.permute.xlu0 %328  ;;  %v488_v2 = vld [vmem:[#allocation7 + $0x5] ss:$8 sm:$0x3]  ;;  %836 = vmatmul.msk.f32.vlgmr.msrb.gmra.mxu0 %vm154_vm4, %v282_v0  ;;  %837 = vmatmul.msk.f32.vlgmr.msrb.gmra.mxu1 %vm154_vm4, %v282_v0 }
  0xd3   :  { %433 = vmatpush.msra.mxu0 %v1022_v1  ;;  %453 = vmatpush.msra.mxu1 %v1030_v3  ;;  %v345_v63 = vsel %vm344_vm3, %v329_v9, %v337_v62  ;;  %v349_v8 = vsel %vm344_vm3, %v337_v62, %v329_v9  ;;  %v369_v1 = vld [vmem:[#allocation5 + $0x18] sm:$0xff]  ;;  %v490_v3 = vperm.slane %v488_v2, 0  ;;  %v491_v12 = vperm.slane %v488_v2, 1  ;;  %v564_v16 = vpop.permute.xlu2 %563 }
  0xd4   :  { %v360_v10 = vmul.f32 %v1203_v18, %v349_v8  ;;  %v361_v11 = vmul.f32 %v1205_v19, %v345_v63 }
  0xd5   :  { %434 = vmatpush.msra.mxu0 %v1037_v4  ;;  %454 = vmatpush.msra.mxu1 %v1040_v5 }
  0xd6   :  { %388 = vmatpush.msrb.mxu2 %v360_v10  ;;  %408 = vmatpush.msrb.mxu3 %v361_v11 }
  0xd7   :  { %435 = vmatpush.msra.mxu0 %v1049_v7  ;;  %455 = vmatpush.msra.mxu1 %v1047_v6 }
  0xd8   :  { %838 = vmatmul.msk.f32.vlgmr.msrb.gmra.mxu2 %vm154_vm4, %v369_v1  ;;  %839 = vmatmul.msk.f32.vlgmr.msrb.gmra.mxu3 %vm154_vm4, %v369_v1 }
  0xda   :  { %v467_v4 = vpop.permute.xlu1 %466  ;;  %v477_v5 = vpop.permute.xlu0 %476  ;;  %840 = vmatmul.msk.f32.vlgmr.msra.gmra.mxu0 %vm154_vm4, %v416_v46  ;;  %841 = vmatmul.msk.f32.vlgmr.msra.gmra.mxu1 %vm154_vm4, %v416_v46 }
  0xdb   :  { %v482_v13 = vsel %vm478_vm5, %v1231_v41, %v477_v5  ;;  %v486_v7 = vsel %vm478_vm5, %v477_v5, %v1231_v41  ;;  %v481_v6 = vsel %vm478_vm5, %v467_v4, %v475_v49  ;;  %v485_v15 = vsel %vm478_vm5, %v475_v49, %v467_v4  ;;  %v554_v28 = vpop.permute.xlu2 %553  ;;  %v662_v41 = vld [vmem:[#allocation7 + $0x7] ss:$8 sm:$0x3] }
  0xdc   :  { %v500_v17 = vmul.f32 %v490_v3, %v482_v13  ;;  %v501_v20 = vmul.f32 %v491_v12, %v486_v7  ;;  %v498_v21 = vmul.f32 %v490_v3, %v481_v6  ;;  %v499_v22 = vmul.f32 %v491_v12, %v485_v15 }
  0xdd   :  { %v664_v44 = vperm.slane %v662_v41, 0  ;;  %v665_v45 = vperm.slane %v662_v41, 1 }
  0xde   :  { %519 = vmatpush.msra.mxu2 %v500_v17  ;;  %539 = vmatpush.msra.mxu3 %v501_v20  ;;  %v590_v20 = vld [vmem:[#allocation5 + $0x30] sm:$0xff] }
  0xe0   :  { %520 = vmatpush.msra.mxu2 %v498_v21  ;;  %540 = vmatpush.msra.mxu3 %v499_v22 }
  0xe2   :  { %v473_v23 = vpop.permute.xlu1 %472  ;;  %v465_v18 = vpop.permute.xlu0 %464 }
  0xe3   :  { %v480_v19 = vsel %vm478_vm5, %v465_v18, %v473_v23  ;;  %v484_v24 = vsel %vm478_vm5, %v473_v23, %v465_v18  ;;  %v649_v43 = vpop.permute.xlu2 %648 }
  0xe4   :  { %v496_v25 = vmul.f32 %v490_v3, %v480_v19  ;;  %v497_v26 = vmul.f32 %v491_v12, %v484_v24 }
  0xe6   :  { %521 = vmatpush.msra.mxu2 %v496_v25  ;;  %541 = vmatpush.msra.mxu3 %v497_v26  ;;  %v677_v26 = vld [vmem:[#allocation5 + $0x38] sm:$0xff] }
  0xea   :  { %v556_v31 = vpop.permute.xlu1 %555  ;;  %v471_v32 = vpop.permute.xlu0 %470 }
  0xeb   :  { %v479_v33 = vsel %vm478_vm5, %v463_v61, %v471_v32  ;;  %v483_v34 = vsel %vm478_vm5, %v471_v32, %v463_v61  ;;  %v569_v35 = vsel %vm565_vm6, %v556_v31, %v564_v16  ;;  %v573_v36 = vsel %vm565_vm6, %v564_v16, %v556_v31 }
  0xec   :  { %v494_v37 = vmul.f32 %v490_v3, %v479_v33  ;;  %v495_v38 = vmul.f32 %v491_v12, %v483_v34  ;;  %v587_v39 = vmul.f32 %v1289_v29, %v569_v35  ;;  %v588_v40 = vmul.f32 %v1291_v30, %v573_v36  ;;  %v639_v53 = vpop.permute.xlu2 %638 }
  0xee   :  { %522 = vmatpush.msra.mxu2 %v494_v37  ;;  %542 = vmatpush.msra.mxu3 %v495_v38 }
  0xef   :  { %606 = vmatpush.msrb.mxu0 %v587_v39  ;;  %626 = vmatpush.msrb.mxu1 %v588_v40 }
  0xf0   :  { %842 = vmatmul.msk.f32.vlgmr.msra.gmra.mxu2 %vm154_vm4, %v503_v42  ;;  %843 = vmatmul.msk.f32.vlgmr.msra.gmra.mxu3 %vm154_vm4, %v503_v42 }
  0xf2   :  { %v651_v47 = vpop.permute.xlu1 %650  ;;  %v643_v48 = vpop.permute.xlu0 %642 }
  0xf3   :  { %v656_v49 = vsel %vm652_vm7, %v643_v48, %v651_v47  ;;  %v660_v50 = vsel %vm652_vm7, %v651_v47, %v643_v48 }
  0xf4   :  { %v674_v51 = vmul.f32 %v664_v44, %v656_v49  ;;  %v675_v52 = vmul.f32 %v665_v45, %v660_v50  ;;  %v558_v1 = vpop.permute.xlu2 %557 }
  0xf6   :  { %693 = vmatpush.msrb.mxu2 %v674_v51  ;;  %713 = vmatpush.msrb.mxu3 %v675_v52 }
  0xfa   :  { %v641_v54 = vpop.permute.xlu1 %640  ;;  %v562_v55 = vpop.permute.xlu0 %561 }
  0xfb   :  { %v568_v56 = vsel %vm565_vm6, %v554_v28, %v562_v55  ;;  %v572_v57 = vsel %vm565_vm6, %v562_v55, %v554_v28  ;;  %v655_v58 = vsel %vm652_vm7, %v641_v54, %v649_v43  ;;  %v659_v59 = vsel %vm652_vm7, %v649_v43, %v641_v54 }
  0xfc   :  { %v585_v60 = vmul.f32 %v1289_v29, %v568_v56  ;;  %v586_v61 = vmul.f32 %v1291_v30, %v572_v57  ;;  %v672_v62 = vmul.f32 %v664_v44, %v655_v58  ;;  %v673_v9 = vmul.f32 %v665_v45, %v659_v59  ;;  %v730_v21 = vpop.permute.xlu2 %729 }
  0xfd   :  { %v751_v28 = vperm.slane %v749_v27, 0 }
  0xfe   :  { %607 = vmatpush.msrb.mxu0 %v585_v60  ;;  %627 = vmatpush.msrb.mxu1 %v586_v61 }
  0xff   :  { %694 = vmatpush.msrb.mxu2 %v672_v62  ;;  %714 = vmatpush.msrb.mxu3 %v673_v9 }
 0x102   :  { %v560_v63 = vpop.permute.xlu1 %559  ;;  %v552_v8 = vpop.permute.xlu0 %551 }
 0x103   :  { %v567_v10 = vsel %vm565_vm6, %v552_v8, %v560_v63  ;;  %v571_v11 = vsel %vm565_vm6, %v560_v63, %v552_v8 }
 0x104   :  { %v583_v0 = vmul.f32 %v1289_v29, %v567_v10  ;;  %v584_v2 = vmul.f32 %v1291_v30, %v571_v11 }
 0x106   :  { %608 = vmatpush.msrb.mxu0 %v583_v0  ;;  %628 = vmatpush.msrb.mxu1 %v584_v2 }
 0x10a   :  { %v550_v3 = vpop.permute.xlu1 %549  ;;  %v647_v12 = vpop.permute.xlu0 %646 }
 0x10b   :  { %v654_v4 = vsel %vm652_vm7, %v639_v53, %v647_v12  ;;  %v658_v5 = vsel %vm652_vm7, %v647_v12, %v639_v53  ;;  %v566_v13 = vsel %vm565_vm6, %v550_v3, %v558_v1  ;;  %v570_v7 = vsel %vm565_vm6, %v558_v1, %v550_v3  ;;  %v764_v53 = vld [vmem:[#allocation5 + $0x40] sm:$0xff] }
 0x10c   :  { %v670_v6 = vmul.f32 %v664_v44, %v654_v4  ;;  %v671_v15 = vmul.f32 %v665_v45, %v658_v5  ;;  %v581_v16 = vmul.f32 %v1289_v29, %v566_v13  ;;  %v582_v17 = vmul.f32 %v1291_v30, %v570_v7  ;;  %v736_v30 = vpop.permute.xlu2 %735 }
 0x10d   :  { %v752_v29 = vperm.slane %v749_v27, 1 }
 0x10e   :  { %695 = vmatpush.msrb.mxu2 %v670_v6  ;;  %715 = vmatpush.msrb.mxu3 %v671_v15 }
 0x10f   :  { %609 = vmatpush.msrb.mxu0 %v581_v16  ;;  %629 = vmatpush.msrb.mxu1 %v582_v17 }
 0x110   :  { %844 = vmatmul.msk.f32.vlgmr.msrb.gmra.mxu0 %vm154_vm4, %v590_v20  ;;  %845 = vmatmul.msk.f32.vlgmr.msrb.gmra.mxu1 %vm154_vm4, %v590_v20 }
 0x112   :  { %v645_v22 = vpop.permute.xlu1 %644  ;;  %v637_v23 = vpop.permute.xlu0 %636 }
 0x113   :  { %v653_v18 = vsel %vm652_vm7, %v637_v23, %v645_v22  ;;  %v657_v19 = vsel %vm652_vm7, %v645_v22, %v637_v23 }
 0x114   :  { %v668_v24 = vmul.f32 %v664_v44, %v653_v18  ;;  %v669_v25 = vmul.f32 %v665_v45, %v657_v19  ;;  %v724_v47 = vpop.permute.xlu2 %723 }
 0x116   :  { %696 = vmatpush.msrb.mxu2 %v668_v24  ;;  %716 = vmatpush.msrb.mxu3 %v669_v25 }
 0x117   :  { %846 = vmatmul.msk.f32.vlgmr.msrb.gmra.mxu2 %vm154_vm4, %v677_v26  ;;  %847 = vmatmul.msk.f32.vlgmr.msrb.gmra.mxu3 %vm154_vm4, %v677_v26 }
 0x11a   :  { %v728_v31 = vpop.permute.xlu1 %727  ;;  %v738_v32 = vpop.permute.xlu0 %737 }
 0x11b   :  { %v743_v33 = vsel %vm739_vm8, %v730_v21, %v738_v32  ;;  %v747_v34 = vsel %vm739_vm8, %v738_v32, %v730_v21  ;;  %v742_v35 = vsel %vm739_vm8, %v728_v31, %v736_v30  ;;  %v746_v36 = vsel %vm739_vm8, %v736_v30, %v728_v31 }
 0x11c   :  { %v761_v37 = vmul.f32 %v751_v28, %v743_v33  ;;  %v762_v38 = vmul.f32 %v752_v29, %v747_v34  ;;  %v759_v39 = vmul.f32 %v751_v28, %v742_v35  ;;  %v760_v40 = vmul.f32 %v752_v29, %v746_v36 }
 0x11e   :  { %780 = vmatpush.msra.mxu0 %v761_v37  ;;  %800 = vmatpush.msra.mxu1 %v762_v38 }
 0x120   :  { %781 = vmatpush.msra.mxu0 %v759_v39  ;;  %801 = vmatpush.msra.mxu1 %v760_v40 }
 0x123   :  { %v734_v41 = vpop.permute.xlu1 %733  ;;  %v726_v42 = vpop.permute.xlu0 %725 }
 0x124   :  { %v741_v43 = vsel %vm739_vm8, %v726_v42, %v734_v41  ;;  %v745_v44 = vsel %vm739_vm8, %v734_v41, %v726_v42 }
 0x125   :  { %v757_v45 = vmul.f32 %v751_v28, %v741_v43  ;;  %v758_v46 = vmul.f32 %v752_v29, %v745_v44 }
 0x127   :  { %782 = vmatpush.msra.mxu0 %v757_v45  ;;  %802 = vmatpush.msra.mxu1 %v758_v46 }
 0x12a   :  { %v218_v56 = vpop.f32.mrf.mxu2  ;;  %v238_v57 = vpop.f32.mrf.mxu3 }
 0x12b   :  { %v732_v48 = vpop.permute.xlu0 %731 }
 0x12c   :  { %v740_v49 = vsel %vm739_vm8, %v724_v47, %v732_v48  ;;  %v744_v50 = vsel %vm739_vm8, %v732_v48, %v724_v47  ;;  %v175_v54 = vpop.f32.mrf.mxu0  ;;  %v195_v55 = vpop.f32.mrf.mxu1 }
 0x12d   :  { %v755_v51 = vmul.f32 %v751_v28, %v740_v49  ;;  %v756_v52 = vmul.f32 %v752_v29, %v744_v50  ;;  %v219_v62 = vadd.f32 %v218_v56, %v175_v54  ;;  %v239_v14 = vadd.f32 %v238_v57, %v195_v55 }
 0x12f   :  { %783 = vmatpush.msra.mxu0 %v755_v51  ;;  %803 = vmatpush.msra.mxu1 %v756_v52 }
 0x130   :  { %848 = vmatmul.msk.f32.vlgmr.msra.gmra.mxu0 %vm154_vm4, %v764_v53  ;;  %849 = vmatmul.msk.f32.vlgmr.msra.gmra.mxu1 %vm154_vm4, %v764_v53 }
 0x14f   :  { %v303_v58 = vpop.f32.mrf.mxu0  ;;  %v323_v59 = vpop.f32.mrf.mxu1 }
 0x150   :  { %v326_v9 = vadd.f32 %v303_v58, %v219_v62  ;;  %v327_v63 = vadd.f32 %v323_v59, %v239_v14 }
 0x157   :  { %v437_v8 = vpop.f32.mrf.mxu0  ;;  %v457_v10 = vpop.f32.mrf.mxu1 }
 0x15b   :  { %v390_v60 = vpop.f32.mrf.mxu2  ;;  %v410_v61 = vpop.f32.mrf.mxu3 }
 0x15c   :  { %v413_v11 = vadd.f32 %v390_v60, %v326_v9  ;;  %v414_v0 = vadd.f32 %v410_v61, %v327_v63 }
 0x15e   :  { %v460_v3 = vadd.f32 %v437_v8, %v413_v11  ;;  %v461_v12 = vadd.f32 %v457_v10, %v414_v0 }
 0x173   :  { %v524_v2 = vpop.f32.mrf.mxu2  ;;  %v544_v1 = vpop.f32.mrf.mxu3 }
 0x174   :  { %v547_v13 = vadd.f32 %v524_v2, %v460_v3  ;;  %v548_v7 = vadd.f32 %v544_v1, %v461_v12 }
 0x18d   :  { %v611_v4 = vpop.f32.mrf.mxu0  ;;  %v631_v5 = vpop.f32.mrf.mxu1 }
 0x18e   :  { %v634_v16 = vadd.f32 %v611_v4, %v547_v13  ;;  %v635_v17 = vadd.f32 %v631_v5, %v548_v7 }
 0x19a   :  { %v698_v6 = vpop.f32.mrf.mxu2  ;;  %v718_v15 = vpop.f32.mrf.mxu3 }
 0x19b   :  { %v721_v20 = vadd.f32 %v698_v6, %v634_v16  ;;  %v722_v21 = vadd.f32 %v718_v15, %v635_v17 }
 0x1ad   :  { %v785_v22 = vpop.f32.mrf.mxu0  ;;  %v805_v23 = vpop.f32.mrf.mxu1 }
 0x1ae   :  { %v808_v18 = vadd.f32 %v785_v22, %v721_v20  ;;  %v809_v19 = vadd.f32 %v805_v23, %v722_v21 }
 0x1b0   :  { %865 = vtanh.f32 %v808_v18 }
 0x1b1   :  { %867 = vtanh.f32 %v809_v19 }
 0x1b6   :  { %v866_v24 = vpop.eup %865 }
 0x1b7   :  { %v868_v25 = vpop.eup %867  ;;  %812 = vst [vmem:[#allocation8] sm:$0xff] %v866_v24 }
 0x1b8   :  { %813 = vst [vmem:[#allocation8 + $0x8] sm:$0xff] %v868_v25 }
 0x1b9   :  { %824 = dma.vmem_to_hbm [thread:$0]  %s820_s9, 256, %s822_s12, [#allocation4]  }
 0x1ba   :  { %969 = dma.done.wait [#allocation4], 256  }
 0x1bb   :  { %970 = vsyncadd [#allocation4], 4294967040 }
 0x1bc   :  { %829 = vsyncpa [#allocation3], 1 }
 0x1bd   :  { %830 = vsyncpa [#allocation6], 1 }
 0x1be   :  { %831 = vsyncpa [#allocation4], 1 }

</bundles_post_ra>
